<compile_context>
chip_gen: v5e
topology: v5e:2x2
jax: 0.10.0
libtpu: 0.0.40
codegen_flags: <defaults>
</compile_context>

<pallas_src>
import jax
import jax.numpy as jnp
from jax.experimental import pallas as pl
from jax.experimental.pallas import tpu as pltpu

_MiB = 1024 * 1024


def _round_up(x, m):
    return ((x + m - 1) // m) * m


def _physical_vmem_bytes():
    """Per-TensorCore physical VMEM (v4/v5e/v6e: 128 MiB, v7x: 64 MiB)."""
    try:
        info = pltpu.get_tpu_info()
        for attr in ("vmem_capacity_bytes", "vmem_bytes", "vmem_size_bytes"):
            v = getattr(info, attr, None)
            if v:
                return int(v)
    except Exception:
        pass
    try:
        kind = jax.devices()[0].device_kind.lower()
    except Exception:
        kind = ""
    if "v7" in kind:
        return 64 * _MiB
    if any(t in kind for t in ("v6", "v5", "v4")):
        return 128 * _MiB
    return 64 * _MiB  # unknown chip: be conservative


def _vmem_limit(phys_vmem, need_bytes):
    """Scoped-VMEM limit: actual need + headroom, capped at 75% of physical."""
    limit = max(32 * _MiB, int(need_bytes) + 8 * _MiB)
    return int(min(limit, (phys_vmem * 3) // 4))


def _sublane_pack(itemsize):
    return max(8, 32 // itemsize)


# ----------------------------------------------------------------------------
# Single-pass fused path: grid over batch, one (1, C, S) block per step.
# ----------------------------------------------------------------------------
def _cse_single_pass(u_flat, w1t, w2t, phys_vmem):
    N, C, S = u_flat.shape
    itemsize = jnp.dtype(u_flat.dtype).itemsize
    inv_s = 1.0 / float(S)

    def kernel(u_ref, w1t_ref, w2t_ref, o_ref):
        # Pool with f32 accumulation; no full-tile f32 temporary materializes.
        z = jnp.sum(u_ref[...], axis=-1, dtype=jnp.float32) * inv_s          # (1, C)
        # Squeeze / Excitation: tiny channel-mixing matmuls (noise vs streaming).
        z1 = jnp.dot(z, w1t_ref[...].astype(jnp.float32),
                     preferred_element_type=jnp.float32)                     # (1, C//2)
        z2 = jnp.dot(z1, w2t_ref[...].astype(jnp.float32),
                     preferred_element_type=jnp.float32)                     # (1, C)
        gate = jax.nn.sigmoid(z2)                                            # (1, C)
        # Multiply in the input's native dtype; broadcast gate over lanes.
        o_ref[...] = u_ref[...] * gate[:, :, None].astype(o_ref.dtype)

    pack = _sublane_pack(itemsize)
    slab_vmem = _round_up(C, pack) * _round_up(S, 128) * itemsize
    w_bytes = (w1t.size + w2t.size) * jnp.dtype(w1t.dtype).itemsize
    vmem_need = 4 * slab_vmem + 2 * w_bytes + 1 * _MiB  # in+out, double-buffered

    cost = pl.CostEstimate(
        flops=2 * N * C * S + 4 * N * C * max(C // 2, 1),
        transcendentals=N * C,
        bytes_accessed=2 * N * C * S * itemsize + w_bytes,
    )

    return pl.pallas_call(
        kernel,
        out_shape=jax.ShapeDtypeStruct((N, C, S), u_flat.dtype),
        grid=(N,),
        in_specs=[
            pl.BlockSpec((1, C, S), lambda n: (n, 0, 0)),
            pl.BlockSpec(w1t.shape, lambda n: (0, 0)),
            pl.BlockSpec(w2t.shape, lambda n: (0, 0)),
        ],
        out_specs=pl.BlockSpec((1, C, S), lambda n: (n, 0, 0)),
        compiler_params=pltpu.CompilerParams(
            dimension_semantics=("parallel",),
            vmem_limit_bytes=_vmem_limit(phys_vmem, vmem_need),
        ),
        cost_estimate=cost,
    )(u_flat, w1t, w2t)


# ----------------------------------------------------------------------------
# Two-pass tiled path for large spatial extents: pool (reduce) then apply.
# ----------------------------------------------------------------------------
def _cse_two_pass(u_flat, w1t, w2t, phys_vmem):
    N, C, S = u_flat.shape
    dtype = u_flat.dtype
    itemsize = jnp.dtype(dtype).itemsize
    pack = _sublane_pack(itemsize)
    c_pad = _round_up(C, pack)
    s128 = _round_up(S, 128)

    # Tile targets (per-tile VMEM bytes).  Pass 1 double-buffers only the input
    # (~2x tile; output is a resident accumulator); pass 2 double-buffers
    # input+output (~4x tile).  Bigger tiles amortize the ~0.35us per-grid-step
    # overhead -- most important at v7x's 3.2 TB/s HBM -- but v7x only has
    # 64 MiB VMEM, so scale with the physical capacity.
    if phys_vmem >= 96 * _MiB:        # v4 / v5e / v6e (128 MiB VMEM)
        pool_target, apply_target = 16 * _MiB, 8 * _MiB
    else:                             # v7x (64 MiB VMEM) or unknown
        pool_target, apply_target = 8 * _MiB, 4 * _MiB

    def _tile(target_bytes):
        lanes = max(128, ((target_bytes // (c_pad * itemsize)) // 128) * 128)
        ts = min(s128, lanes)
        n = pl.cdiv(s128, ts)
        ts = _round_up(pl.cdiv(s128, n), 128)       # balance tile sizes
        return ts, pl.cdiv(S, ts)

    ts_pool, nt_pool = _tile(pool_target)
    ts_apply, nt_apply = _tile(apply_target)

    # ---- Pass 1: per-(N, C) spatial sum via resident f32 accumulator. ----
    def pool_kernel(u_ref, sum_ref):
        s_idx = pl.program_id(1)

        @pl.when(s_idx == 0)
        def _():
            sum_ref[...] = jnp.zeros_like(sum_ref)

        x = u_ref[...]                                       # (1, C, ts_pool)
        if S % ts_pool != 0:
            # Ragged last tile: out-of-bounds lanes hold unspecified values;
            # mask them so they do not corrupt the channel sums.
            rem = S - (nt_pool - 1) * ts_pool
            limit = jnp.where(s_idx == nt_pool - 1, rem, ts_pool)
            lane = jax.lax.broadcasted_iota(jnp.int32, x.shape, 2)
            x = jnp.where(lane < limit, x, jnp.zeros_like(x))
        # Accumulate in f32 without materializing a full f32 copy of the tile.
        sum_ref[...] += jnp.sum(x, axis=-1, dtype=jnp.float32, keepdims=True)

    pool_need = 2 * c_pad * ts_pool * itemsize + 2 * c_pad * 128 * 4 + 1 * _MiB
    sums = pl.pallas_call(
        pool_kernel,
        out_shape=jax.ShapeDtypeStruct((N, C, 1), jnp.float32),
        grid=(N, nt_pool),
        in_specs=[pl.BlockSpec((1, C, ts_pool), lambda n, s: (n, 0, s))],
        out_specs=pl.BlockSpec((1, C, 1), lambda n, s: (n, 0, 0)),
        compiler_params=pltpu.CompilerParams(
            dimension_semantics=("parallel", "arbitrary"),
            vmem_limit_bytes=_vmem_limit(phys_vmem, pool_need),
        ),
        cost_estimate=pl.CostEstimate(
            flops=N * C * S,
            transcendentals=0,
            bytes_accessed=N * C * S * itemsize + N * C * 4,
        ),
    )(u_flat)

    # ---- Gate: O(N*C^2) -- noise; computed in plain XLA between the passes. ----
    z = sums[:, :, 0] * (1.0 / float(S))                 # divide by the TRUE S
    gate = jax.nn.sigmoid(
        (z @ w1t.astype(jnp.float32)) @ w2t.astype(jnp.float32)
    )[:, :, None]                                        # (N, C, 1) float32

    # ---- Pass 2: stream U again and apply the broadcast gate. ----
    def apply_kernel(gate_ref, u_ref, o_ref):
        b = pl.program_id(0)
        g = gate_ref[pl.ds(b, 1), :, :]                  # (1, C, 1), resident
        o_ref[...] = u_ref[...] * g.astype(o_ref.dtype)
        # Ragged last S-tile: OOB lanes of this output block are discarded by
        # Pallas at writeback, so no padded copy / post-slice is needed.

    apply_need = (4 * c_pad * ts_apply * itemsize
                  + N * c_pad * 128 * 4 + 1 * _MiB)
    out = pl.pallas_call(
        apply_kernel,
        out_shape=jax.ShapeDtypeStruct((N, C, S), dtype),
        grid=(N, nt_apply),
        in_specs=[
            # Whole (tiny) gate array kept resident in VMEM: constant index map
            # means it is DMA'd once, not per batch.
            pl.BlockSpec((N, C, 1), lambda n, s: (0, 0, 0)),
            pl.BlockSpec((1, C, ts_apply), lambda n, s: (n, 0, s)),
        ],
        out_specs=pl.BlockSpec((1, C, ts_apply), lambda n, s: (n, 0, s)),
        compiler_params=pltpu.CompilerParams(
            dimension_semantics=("parallel", "parallel"),
            vmem_limit_bytes=_vmem_limit(phys_vmem, apply_need),
        ),
        cost_estimate=pl.CostEstimate(
            flops=N * C * S,
            transcendentals=0,
            bytes_accessed=2 * N * C * S * itemsize + N * C * 4,
        ),
    )(gate, u_flat)

    return out


# ----------------------------------------------------------------------------
# Public wrapper.
# ----------------------------------------------------------------------------
def cse_forward(U, w_squeeze, w_excite, *, single_pass_max_bytes=None):
    """cSE forward.

    U: (N, C, D, H, W); w_squeeze: (C//2, C); w_excite: (C, C//2)  (PyTorch
    Conv3d kernel_size=1, bias=False weight layouts, squeezed to 2-D).
    single_pass_max_bytes: optional override for the per-batch VMEM-slab
    threshold that selects the fused single-pass path (None = auto per chip).
    """
    N, C, D, H, W = U.shape
    S = D * H * W
    itemsize = jnp.dtype(U.dtype).itemsize

    # Pre-transpose the (static) weights at trace time so kernels do plain z @ W.
    w1t = jnp.asarray(w_squeeze).T   # (C, C//2)
    w2t = jnp.asarray(w_excite).T    # (C//2, C)

    u_flat = U.reshape(N, C, S)

    phys_vmem = _physical_vmem_bytes()
    pack = _sublane_pack(itemsize)
    # Actual VMEM footprint of one (1, C, S) slab after sublane/lane padding.
    slab_vmem = _round_up(C, pack) * _round_up(S, 128) * itemsize
    if single_pass_max_bytes is None:
        # Single-pass holds input + output slabs, each double-buffered (~4x
        # slab) plus small f32/weight temporaries; keep the total under ~70%
        # of physical VMEM.  (~22 MiB slabs on v5e/v6e, ~10 MiB on v7x.)
        single_pass_max_bytes = max(0, (int(phys_vmem * 0.70) - 2 * _MiB) // 4)

    # NOTE: this op is HBM-bandwidth bound and a single TensorCore's DMA can
    # saturate HBM on all generations, so we do not restructure the grid for
    # N==1 on multi-TC chips; the two-pass path's tile axis is already parallel.
    if slab_vmem <= single_pass_max_bytes:
        out_flat = _cse_single_pass(u_flat, w1t, w2t, phys_vmem)
    else:
        out_flat = _cse_two_pass(u_flat, w1t, w2t, phys_vmem)
    return out_flat.reshape(N, C, D, H, W)


def cse_reference(U, w_squeeze, w_excite):
    """Pure-JAX reference matching the PyTorch module semantics (no ReLU)."""
    z = jnp.mean(U, axis=(2, 3, 4))          # (N, C)
    z1 = z @ w_squeeze.T                     # (N, C//2)
    z2 = z1 @ w_excite.T                     # (N, C)
    gate = jax.nn.sigmoid(z2)                # (N, C)
    return U * gate[:, :, None, None, None]


if __name__ == "__main__":
    key = jax.random.PRNGKey(0)

    configs = [
        (2, 4, 2, 8, 8),   # S = 128  (lane-aligned)
        (2, 6, 3, 5, 7),   # S = 105  (ragged lane tail, no pad/slice copies)
    ]

    for (N, C, D, H, W) in configs:
        k_u, k_w1, k_w2, key = jax.random.split(key, 4)
        U = jax.random.normal(k_u, (N, C, D, H, W), dtype=jnp.float32)
        w_squeeze = jax.random.normal(k_w1, (C // 2, C), dtype=jnp.float32) * 0.5
        w_excite = jax.random.normal(k_w2, (C, C // 2), dtype=jnp.float32) * 0.5

        ref = cse_reference(U, w_squeeze, w_excite)

        # Fused single-pass path (default for slabs that fit VMEM).
        out1 = jax.block_until_ready(cse_forward(U, w_squeeze, w_excite))
        assert out1.shape == U.shape
        assert jnp.allclose(out1, ref, atol=1e-5, rtol=1e-5), "single-pass mismatch"

        # Force the tiled two-pass path (the large-S structure) and check it too.
        out2 = jax.block_until_ready(
            cse_forward(U, w_squeeze, w_excite, single_pass_max_bytes=0)
        )
        assert jnp.allclose(out2, ref, atol=1e-5, rtol=1e-5), "two-pass mismatch"

    print("KERNEL_OK")
</pallas_src>

<mosaic_0001>
module attributes {stable_mosaic.version = 11 : i64} {
  func.func @kernel(%arg0: i32, %arg1: memref<1x4x128xf32, #tpu.memory_space<vmem>>, %arg2: memref<4x2xf32, #tpu.memory_space<vmem>>, %arg3: memref<2x4xf32, #tpu.memory_space<vmem>>, %arg4: memref<1x4x128xf32, #tpu.memory_space<vmem>>) attributes {dimension_semantics = [#tpu.dimension_semantics<parallel>], iteration_bounds = array<i64: 2>, scalar_prefetch = 0 : i64, scratch_operands = 0 : i64, tpu.core_type = #tpu.core_type<tc>, window_params = [{transform_indices = @transform_0, window_bounds = array<i64: 1, 4, 128>}, {pipeline_mode = #tpu.pipeline_mode<synchronous>, transform_indices = @transform_1, window_bounds = array<i64: 4, 2>}, {pipeline_mode = #tpu.pipeline_mode<synchronous>, transform_indices = @transform_2, window_bounds = array<i64: 2, 4>}, {transform_indices = @transform_3, window_bounds = array<i64: 1, 4, 128>}]} {
    %c0 = arith.constant 0 : index
    %c0_0 = arith.constant 0 : index
    %c0_1 = arith.constant 0 : index
    %0 = vector.load %arg1[%c0, %c0_0, %c0_1] : memref<1x4x128xf32, #tpu.memory_space<vmem>>, vector<1x4x128xf32>
    %cst = arith.constant dense<0.000000e+00> : vector<1x4xf32>
    %1 = vector.multi_reduction <add>, %0, %cst [2] : vector<1x4x128xf32> to vector<1x4xf32>
    %cst_2 = arith.constant 7.812500e-03 : f32
    %2 = vector.broadcast %cst_2 : f32 to vector<1x4xf32>
    %3 = arith.mulf %1, %2 : vector<1x4xf32>
    %c0_3 = arith.constant 0 : index
    %c0_4 = arith.constant 0 : index
    %4 = vector.load %arg2[%c0_3, %c0_4] : memref<4x2xf32, #tpu.memory_space<vmem>>, vector<4x2xf32>
    %cst_5 = arith.constant dense<0.000000e+00> : vector<1x2xf32>
    %5 = tpu.matmul %3, %4, %cst_5 {dimension_numbers = #tpu.dot_dimension_numbers<[1], [0], [0], [1], [0, 0, 1, 1], [], []>} : vector<1x4xf32>, vector<4x2xf32>, vector<1x2xf32> -> vector<1x2xf32>
    %c0_6 = arith.constant 0 : index
    %c0_7 = arith.constant 0 : index
    %6 = vector.load %arg3[%c0_6, %c0_7] : memref<2x4xf32, #tpu.memory_space<vmem>>, vector<2x4xf32>
    %cst_8 = arith.constant dense<0.000000e+00> : vector<1x4xf32>
    %7 = tpu.matmul %5, %6, %cst_8 {dimension_numbers = #tpu.dot_dimension_numbers<[1], [0], [0], [1], [0, 0, 1, 1], [], []>} : vector<1x2xf32>, vector<2x4xf32>, vector<1x4xf32> -> vector<1x4xf32>
    %8 = arith.negf %7 : vector<1x4xf32>
    %9 = math.exp %8 : vector<1x4xf32>
    %cst_9 = arith.constant 1.000000e+00 : f32
    %10 = vector.broadcast %cst_9 : f32 to vector<1x4xf32>
    %11 = arith.addf %10, %9 : vector<1x4xf32>
    %12 = arith.divf %10, %11 : vector<1x4xf32>
    %c0_10 = arith.constant 0 : index
    %c0_11 = arith.constant 0 : index
    %c0_12 = arith.constant 0 : index
    %13 = vector.load %arg1[%c0_10, %c0_11, %c0_12] : memref<1x4x128xf32, #tpu.memory_space<vmem>>, vector<1x4x128xf32>
    %14 = vector.shape_cast %12 : vector<1x4xf32> to vector<1x4x1xf32>
    %15 = vector.broadcast %14 : vector<1x4x1xf32> to vector<1x4x128xf32>
    %16 = arith.mulf %13, %15 : vector<1x4x128xf32>
    %c0_13 = arith.constant 0 : index
    %c0_14 = arith.constant 0 : index
    %c0_15 = arith.constant 0 : index
    %17 = vector.load %arg4[%c0_13, %c0_14, %c0_15] : memref<1x4x128xf32, #tpu.memory_space<vmem>>, vector<1x4x128xf32>
    tpu.vector_store %arg4[%c0_13, %c0_14, %c0_15], %16 {strides = array<i32>} : memref<1x4x128xf32, #tpu.memory_space<vmem>>, vector<1x4x128xf32>,
    return
  }
  func.func @transform_0(%arg0: i32) -> (i32, i32, i32) {
    %c0_i32 = arith.constant 0 : i32
    %c0_i32_0 = arith.constant 0 : i32
    %c0_i32_1 = arith.constant 0 : i32
    return %arg0, %c0_i32, %c0_i32_0 : i32, i32, i32
  }
  func.func @transform_1(%arg0: i32) -> (i32, i32) {
    %c0_i32 = arith.constant 0 : i32
    %c0_i32_0 = arith.constant 0 : i32
    %c0_i32_1 = arith.constant 0 : i32
    return %c0_i32, %c0_i32_0 : i32, i32
  }
  func.func @transform_2(%arg0: i32) -> (i32, i32) {
    %c0_i32 = arith.constant 0 : i32
    %c0_i32_0 = arith.constant 0 : i32
    %c0_i32_1 = arith.constant 0 : i32
    return %c0_i32, %c0_i32_0 : i32, i32
  }
  func.func @transform_3(%arg0: i32) -> (i32, i32, i32) {
    %c0_i32 = arith.constant 0 : i32
    %c0_i32_0 = arith.constant 0 : i32
    %c0_i32_1 = arith.constant 0 : i32
    return %arg0, %c0_i32, %c0_i32_0 : i32, i32, i32
  }
}

</mosaic_0001>

<bundles_post_ra>
// kernel: tpu_custom_call.1
= control target key start
LH: loop header
LB: loop body
LE: loop exit
PB: predicated region body
PF: predicated region fallthrough
CT: control target
= control target key end

     0   :  { %8 = vsyncpa [#allocation3], 0  ;;  %s691_s0 = inlined_call_operand.hbm [shape: f32[2,4,128], index: 0, kind: input, shape index: {}]   ;;  %s692_s1 = inlined_call_operand.vmem [shape: f32[4,2], index: 1, kind: input, shape index: {}]   ;;  %s693_s2 = inlined_call_operand.vmem [shape: f32[2,4], index: 2, kind: input, shape index: {}]   ;;  %s694_s3 = inlined_call_operand.hbm [shape: f32[2,4,128], index: 3, kind: output, shape index: {}]  }
   0x1   :  { %10 = vsyncpa [#allocation3 + $0x1], 0 }
   0x2   :  { %11 = vsyncpa [#allocation4], 0 }
   0x3   :  { %13 = vsyncpa [#allocation4 + $0x1], 0  ;;  %s554_s12 = smov 0   ;;  %s556_s13 = smov 0  }
   0x4   :  { %s558_s14 = smov 0   ;;  %s560_s15 = smov 0  }
   0x5 LB: > { %s575_s16 = sadd.s32 4294967295, %s532_s15   ;;  %s368_s17 = sadd.s32 4294967294, %s532_s15   ;;  %s532_s15 = sphi %s560_s15, %s704_s15   ;;  %s528_s14 = sphi %s558_s14, %s703_s14   ;;  %s524_s13 = sphi %s556_s13, %s702_s13   ;;  %s520_s12 = sphi %s554_s12, %s701_s12  }
   0x6   : > { %s579_s18 = sadd.s32 1, %s532_s15   ;;  %s26_s19 = sadd.s32 1, %s528_s14 }
   0x7   : > { %s23_s20 = ssub.s32 %s532_s15, %s579_s18  ;;  %p33_p0 = scmp.ne.s32.totalorder %s528_s14, %s524_s13 }
   0x8   : > { %p24_p1 = scmp.eq.s32.totalorder %s23_s20, 0  ;;  %p34_p2 = scmp.eq.s32.totalorder %s532_s15, 0 }
   0x9   : > { %p39_p3 = scmp.ne.s32.totalorder %s524_s13, %s520_s12  ;;  %p40_p4 = scmp.eq.s32.totalorder %s575_s16, 0 }
   0xa   : > { %s591_s21 = scalar_select %p24_p1, %s528_s14, %s26_s19  }
   0xb   : > { %p593_p5 = por %p34_p2, %p33_p0  ;;  %p597_p6 = por %p40_p4, %p39_p3 }
   0xc   : > { %p105_p7 = scmp.eq.s32.totalorder %s575_s16, 1  ;;  %p111_p8 = scmp.eq.s32.totalorder %s368_s17, 1 }
   0xd   : > { %p397_p10 = scmp.lt.s32.totalorder %s532_s15, 2  ;;  %s137_s26 = sand.u32 1, %s528_s14  }
   0xe   : > { %p604_p11 = por %p105_p7, %p33_p0  ;;  %p608_p12 = por %p111_p8, %p39_p3 }
   0xf   : > { %s372_s27 = sshll.u32 %s532_s15, 2  ;;  %s371_s28 = sshll.u32 %s137_s26, 2 }
  0x10   : > { %s145_s4 = scalar_lea.hbm %s691_s0, %s372_s27  ;;  %s141_s6 = scalar_lea.vmem [#allocation2], %s371_s28 }
  0x11   : > { %s147_s5 = sshll.u32 %s145_s4, 4  ;;  %s149_s7 = sshll.u32 %s141_s6, 4  ;;  %s148_s5 = int_to_ptr.hbm [resolvable:$true] %s147_s5  ;;  %s150_s7 = int_to_ptr.vmem [resolvable:$true] %s149_s7 }
  0x12   : > { %p619_p13 = pnand %p397_p10, %p593_p5  ;;  %p373_p0 = scmp.ge.s32.totalorder %s532_s15, 1 }
  0x13   : > { %p154_p1 = scmp.lt.s32.totalorder %s532_s15, 3  ;;  %s138_s9 = scalar_lea.sflag [#allocation3], %s137_s26 }
  0x14   : > { %s436_s10 = sshra.s32 %s148_s5, 4  ;;  %p440_p3 = pneg %p619_p13  ;;  %s437_s10 = int_to_ptr.hbm [resolvable:$true] %s436_s10 }
  0x15   : > { %s438_s11 = scalar_lea.hbm %s437_s10, 4  ;;  %s443_s20 = scalar_lea.hbm %s691_s0, 8 }
  0x16   : > { %p439_p2 = scmp.ne.s32.totalorder %s437_s10, %s438_s11  ;;  %p444_p5 = scmp.lt.s32.totalorder %s437_s10, %s691_s0 }
  0x17   : > { %p445_p8 = scmp.lt.s32.totalorder %s443_s20, %s438_s11 }
  0x18   : > { %p441_p4 = pnand %p440_p3, %p439_p2 }
  0x19   : > { %p446_p10 = por %p445_p8, %p444_p5 }
  0x1a   : > { %p442_p7 = pneg %p441_p4 }
  0x1c   : > { %p447_p9 = pnand %p446_p10, %p442_p7 }
  0x1e   : > { %450 = shalt.err (!%p447_p9)
}
  0x1f   : > { %392 = dma.hbm_to_vmem [thread:$0]  (!%p619_p13), %s148_s5, 64, %s150_s7, %s138_s9  }
  0x20   : > { %p155_p2 = pnand %p373_p0, %p154_p1 }
  0x21   : > { %s640_s26 = sand.u32 (!%p155_p2), 1, %s524_s13  }
  0x22   : > { %158 = sbr.rel (%p155_p2) target bundleno = 564 (0x234), region = 32  ;;  %s374_s28 = sshll.u32 (!%p155_p2), %s640_s26, 2 }
  0x23   : > { %s161_s29 = scalar_lea.sflag (!%p155_p2), [#allocation3], %s640_s26  ;;  %s164_s30 = scalar_lea.vmem (!%p155_p2), [#allocation2], %s374_s28 }
  0x27   : > { %511 = dma.done.wait (%p597_p6), %s161_s29, 64  }
  0x28   : > { %513 = vsyncadd (%p597_p6), %s161_s29, 4294967232  ;;  %vm189_vm0 = vcmask 1043456   ;;  %v188_v0 = vld [vmem:[%s164_s30] sm:$0xf]  ;;  %v196_v3 = vlaneseq  ;;  %vm199_vm1 = vcmask 31744   ;;  %vm230_vm2 = vcmask 1041408  }
  0x29   : > { %v190_v1 = vsel %vm189_vm0, %v188_v0, 0.0  ;;  %v194_v2 = vld [vmem:[%s692_s1] sm:$0xf]  ;;  %vm226_vm3 = vcmask 15360   ;;  %s382_s23 = sshll.u32 %s575_s16, 2  ;;  %s187_s11 = scalar_lea.vmem [#allocation5], %s374_s28 }
  0x2a   : > { %191 = vadd.xlane.f32.xlu0 %v190_v1  ;;  %376 = vmatpush.msk.msra.mxu0 %vm189_vm0, %v194_v2  ;;  %v197_v4 = vand.u32 127, %v196_v3  ;;  %v225_v8 = vld [vmem:[%s693_s2] sm:$0x3]  ;;  %v275_v10 = vshrl.u32 %v196_v3, 7  ;;  %s293_s10 = scalar_lea.hbm %s694_s3, %s382_s23  ;;  %s295_s17 = sshll.u32 %s187_s11, 4  ;;  %s296_s17 = int_to_ptr.vmem [resolvable:$true] %s295_s17 }
  0x2b   : > { %378 = vmatpush.msk.msra.mxu1 %vm230_vm2, %v225_v8  ;;  %s297_s19 = sshll.u32 %s293_s10, 4  ;;  %s283_s20 = scalar_lea.sflag [#allocation4], %s640_s26  ;;  %s298_s19 = int_to_ptr.hbm [resolvable:$true] %s297_s19 }
  0x2c   : > { %431 = vset.pattern.permute.xlu0 %v275_v10  ;;  %s480_s22 = sshra.s32 %s298_s19, 4  ;;  %s486_s30 = scalar_lea.hbm %s694_s3, 8  ;;  %s481_s22 = int_to_ptr.hbm [resolvable:$true] %s480_s22 }
  0x2d   : > { %s482_s27 = scalar_lea.hbm %s481_s22, 4  ;;  %p487_p0 = scmp.lt.s32.totalorder %s481_s22, %s694_s3 }
  0x2e   : > { %p483_p6 = scmp.ne.s32.totalorder %s481_s22, %s482_s27  ;;  %p488_p1 = scmp.lt.s32.totalorder %s486_s30, %s482_s27 }
  0x30   : > { %p484_p9 = pnand %p483_p6, %p604_p11  ;;  %p489_p3 = por %p488_p1, %p487_p0 }
  0x32   : > { %p485_p13 = pneg %p484_p9 }
  0x34   : > { %p490_p4 = pnand %p489_p3, %p485_p13 }
  0x9d   : > { %v192_v5 = vpop.xlane.xlu0 %191 }
  0x9e   : > { %v193_v6 = vmul.f32 0.0078125, %v192_v5 }
  0xa0   : > { %v198_v7 = vperm.slane %v193_v6, %v197_v4 }
  0xa2   : > { %377 = vmatmul.msk.f32.vlgmr.msra.gmra.mxu0 %vm199_vm1, %v198_v7 }
 0x11f   : > { %v222_v9 = vpop.f32.mrf.mxu0 }
 0x120   : > { %379 = vmatmul.msk.f32.vlgmr.msra.gmra.mxu1 %vm226_vm3, %v222_v9 }
 0x19d   : > { %v251_v11 = vpop.f32.mrf.mxu1 }
 0x19e   : > { %v380_v12 = vmul.f32 -1.442695, %v251_v11 }
 0x1a0   : > { %432 = vpow2.f32 %v380_v12 }
 0x1a6   : > { %v433_v13 = vpop.eup %432 }
 0x1a7   : > { %v257_v14 = vadd.f32 1.0, %v433_v13 }
 0x1a9   : > { %434 = vrcp.f32 %v257_v14  ;;  %v269_v18 = vand.u32 2147483648, %v257_v14  ;;  %v267_v20 = vand.u32 2147483647, %v257_v14  ;;  %vm263_vm5 = vweird.f32 %v257_v14 }
 0x1ab   : > { %v270_v22 = vor.u32 1.1754944e-38, %v269_v18  ;;  %vm268_vm7 = vcmp.eq.f32.partialorder %v267_v20, 8.507059e+37 }
 0x1af   : > { %v435_v15 = vpop.eup %434 }
 0x1b0   : > { %v259_v16 = vmul.f32 %v435_v15, %v257_v14  ;;  %vm264_vm4 = vweird.f32 %v435_v15 }
 0x1b1   : > { %vm265_vm6 = vmor %vm263_vm5, %vm264_vm4 }
 0x1b2   : > { %v260_v17 = vsub.f32 1.0, %v259_v16 }
 0x1b4   : > { %v261_v19 = vmul.f32 %v435_v15, %v260_v17 }
 0x1b6   : > { %v262_v21 = vadd.f32 %v435_v15, %v261_v19 }
 0x1b8   : > { %v266_v23 = vsel %vm265_vm6, %v435_v15, %v262_v21 }
 0x1b9   : > { %v271_v24 = vsel %vm268_vm7, %v270_v22, %v266_v23 }
 0x1ba   : > { %v273_v25 = vperm.slane %v271_v24, 0 }
 0x1bc   : > { %278 = vperm.xlu0 %431, %v273_v25  }
 0x22e   : > { %v279_v26 = vpop.permute.xlu0 %278 }
 0x22f   : > { %v280_v27 = vmul.f32 %v279_v26, %v188_v0 }
 0x231   : > { %281 = vst [vmem:[%s187_s11] sm:$0xf] %v280_v27 }
 0x232   : > { %493 = shalt.err (!%p490_p4)
}
 0x233   : > { %387 = dma.vmem_to_hbm [thread:$0]  (%p604_p11), %s296_s17, 64, %s298_s19, %s283_s20  }
 0x234 PF: > { %s309_s26 = sand.u32 1, %s520_s12   ;;  %p700_p7 = scmp.ge.s32.totalorder %s532_s15, 2 }
 0x235   : > { %s310_s5 = scalar_lea.sflag [#allocation4], %s309_s26 }
 0x236   : > { %p394_p5 = pnand %p700_p7, %p608_p12 }
 0x238   : > { %p395_p8 = pneg %p394_p5 }
 0x23a   : > { %515 = dma.done.wait (%p395_p8), %s310_s5, 64  }
 0x23b   : > { %517 = vsyncadd (%p395_p8), %s310_s5, 4294967232  ;;  %p16_p10 = scmp.ge.s32.totalorder %s579_s18, 4   ;;  %s701_s12 = smov %s524_s13 }
 0x23c   : > { %s702_s13 = smov %s528_s14  ;;  %s703_s14 = smov %s591_s21 }
 0x23d   : > { %s704_s15 = smov %s579_s18  ;;  %18 = sbr.rel (!%p16_p10) target bundleno = 5 (0x5), region = 77 }
 0x242   :  { %316 = vsyncpa [#allocation3], 1 }
 0x243   :  { %318 = vsyncpa [#allocation3 + $0x1], 1 }
 0x244   :  { %319 = vsyncpa [#allocation4], 1 }
 0x245   :  { %321 = vsyncpa [#allocation4 + $0x1], 1 }

</bundles_post_ra>
